<compile_context>
chip_gen: v7x
topology: tpu7x:2x2x1
jax: 0.10.0
libtpu: 0.0.40
codegen_flags: <defaults>
</compile_context>

<pallas_src>
import jax
import jax.numpy as jnp
from jax.experimental import pallas as pl
from jax.experimental.pallas import tpu as pltpu

BN_EPS = 1e-5
LANES = 128


def _round_up(n, m):
    return ((n + m - 1) // m) * m


def _make_kernel(n_layers):
    """Fused BN -> Linear (-> ReLU -> ...) kernel over a (Gb, B, W) activation block."""

    def kernel(x_ref, p_ref, w_ref, o_ref):
        P = p_ref[...]                 # (3*n_layers, W)  packed gamma/beta/bias
        h = x_ref[...]                 # (Gb, B, W) f32
        Gb, B, W = h.shape

        for i in range(n_layers):
            if i != 0:
                h = jnp.maximum(h, 0.0)                       # ReLU between blocks

            gm = P[3 * i + 0:3 * i + 1, :]                    # gamma (1, W)
            be = P[3 * i + 1:3 * i + 2, :]                    # beta  (1, W)
            b = P[3 * i + 2:3 * i + 3, :]                     # bias  (1, W)

            # Training-mode BN statistics, per group (axis=1 is the batch axis).
            # Two-pass variance for numerical parity with the PyTorch reference.
            mean = jnp.mean(h, axis=1, keepdims=True)         # (Gb, 1, W)
            var = jnp.mean((h - mean) ** 2, axis=1, keepdims=True)

            s = gm * jax.lax.rsqrt(var + BN_EPS)              # (Gb, 1, W); rsqrt -> EUP
            h_bn = (h - mean) * s + be                        # VPU affine, no extra matmul

            # Flatten groups for one fat MXU pass: (Gb*B, W) @ (W, W).
            # B rows per group are a whole f32 sublane group, so this reshape is a view.
            hflat = h_bn.reshape(Gb * B, W)
            w = w_ref[i]                                      # (W, W), padded lane-dense
            h = (jnp.dot(hflat, w, preferred_element_type=jnp.float32) + b
                 ).reshape(Gb, B, W)

        o_ref[...] = h                                        # unmasked 128-lane store

    return kernel


def _pack_params(params, maxw):
    """Pack gamma/beta/bias into one (3*L, maxw) slab and weights into (L, maxw, maxw).

    Zero padding keeps padded feature columns exactly zero through the whole net.
    """
    n_layers = len(params) // 4
    slab = jnp.zeros((3 * n_layers, maxw), jnp.float32)
    wslab = jnp.zeros((n_layers, maxw, maxw), jnp.float32)
    for i in range(n_layers):
        gm, be, w, b = params[4 * i:4 * i + 4]
        slab = slab.at[3 * i + 0, :gm.shape[1]].set(gm[0])
        slab = slab.at[3 * i + 1, :be.shape[1]].set(be[0])
        slab = slab.at[3 * i + 2, :b.shape[1]].set(b[0])
        wslab = wslab.at[i, :w.shape[0], :w.shape[1]].set(w)
    return slab, wslab


def decoder_forward_grouped(xg, params, num_blocks=1):
    """xg: (G, B, n_latent) f32 -- G independent decoder batches in one pallas_call.

    BN statistics are computed per group, so the result matches G independent module
    forward calls.  num_blocks=1 runs everything in a single fat step (best on
    v5e/v6e at small G); num_blocks=2 gives one fat block per v7x TensorCore.
    """
    G, B, n_latent = xg.shape
    n_layers = len(params) // 4
    weights = [params[4 * i + 2] for i in range(n_layers)]
    out_dim = weights[-1].shape[1]

    # One uniform padded width for every layer (assumes max width modest; wider
    # architectures would want per-layer padded widths instead).
    widths = [n_latent] + [w.shape[1] for w in weights]
    maxw = _round_up(max(widths), LANES)

    slab, wslab = _pack_params(params, maxw)
    x_pad = jnp.pad(xg, ((0, 0), (0, 0), (0, maxw - n_latent))) if maxw > n_latent else xg

    assert G % num_blocks == 0, "num_blocks must divide G"
    Gb = G // num_blocks

    kernel = _make_kernel(n_layers)

    out = pl.pallas_call(
        kernel,
        out_shape=jax.ShapeDtypeStruct((G, B, maxw), jnp.float32),
        grid=(num_blocks,),
        in_specs=[
            pl.BlockSpec((Gb, B, maxw), lambda g: (g, 0, 0)),     # Gb groups per step
            pl.BlockSpec(slab.shape, lambda g: (0, 0)),           # packed gamma/beta/bias
            pl.BlockSpec(wslab.shape, lambda g: (0, 0, 0)),       # packed weights
        ],
        out_specs=pl.BlockSpec((Gb, B, maxw), lambda g: (g, 0, 0)),
        compiler_params=pltpu.CompilerParams(
            dimension_semantics=("parallel",),   # shard blocks across TCs on v7x
        ),
    )(x_pad, slab, wslab)

    return out[..., :out_dim]


def decoder_forward(x, params):
    """Module-semantics entry point: x (B, n_latent) -> (B, out)."""
    return decoder_forward_grouped(x[None], params)[0]


def init_params(key, arch):
    """PyTorch-default init. BN: gamma=1, beta=0. Linear: U(-1/sqrt(fan_in), +).

    Linear weights are stored pre-transposed as (in, out); BN/bias params as (1, F).
    """
    params = []
    for i in range(len(arch) - 1):
        fin, fout = arch[i], arch[i + 1]
        key, kw, kb = jax.random.split(key, 3)
        bound = 1.0 / jnp.sqrt(jnp.float32(fin))
        gamma = jnp.ones((1, fin), jnp.float32)
        beta = jnp.zeros((1, fin), jnp.float32)
        w = jax.random.uniform(kw, (fin, fout), jnp.float32, -bound, bound)
        b = jax.random.uniform(kb, (1, fout), jnp.float32, -bound, bound)
        params += [gamma, beta, w, b]
    return params


def decoder_reference(x, params):
    """Pure-JAX reference (two-pass BN, matching PyTorch training-mode semantics)."""
    h = x
    n_layers = len(params) // 4
    for i in range(n_layers):
        gm, be, w, b = params[4 * i:4 * i + 4]
        if i != 0:
            h = jnp.maximum(h, 0.0)
        mean = jnp.mean(h, axis=0, keepdims=True)
        var = jnp.mean((h - mean) ** 2, axis=0, keepdims=True)
        h = (h - mean) * jax.lax.rsqrt(var + BN_EPS) * gm + be
        h = h @ w + b
    return h


# TODO(synk): BatchNorm1d running_mean/running_var buffer updates (training side
# effects) are not emitted; only the forward activations are produced.

if __name__ == "__main__":
    # Small shapes consistent with the module: Decoder(arch=[32, 64, 128], n_latent=4)
    n_latent = 4
    arch = [n_latent, 32, 64, 128]
    B = 8      # batch per group
    G = 4      # independent groups amortized into one call

    key = jax.random.PRNGKey(0)
    key, kx = jax.random.split(key)
    xg = jax.random.normal(kx, (G, B, n_latent), jnp.float32)
    params = init_params(key, arch)

    ref = jnp.stack([decoder_reference(xg[g], params) for g in range(G)])

    # Single fat step (all G groups in one kernel invocation) -- default path.
    out = decoder_forward_grouped(xg, params, num_blocks=1)
    out = jax.block_until_ready(out)
    assert out.shape == (G, B, arch[-1])
    assert jnp.allclose(out, ref, atol=1e-3, rtol=1e-3), "grouped(num_blocks=1) mismatch"

    # Two fat blocks (one per v7x TensorCore) -- also correct on v5e/v6e.
    out2 = decoder_forward_grouped(xg, params, num_blocks=2)
    out2 = jax.block_until_ready(out2)
    assert jnp.allclose(out2, ref, atol=1e-3, rtol=1e-3), "grouped(num_blocks=2) mismatch"

    # Single-batch (module-semantics) path.
    out1 = decoder_forward(xg[0], params)
    out1 = jax.block_until_ready(out1)
    assert out1.shape == (B, arch[-1])
    assert jnp.allclose(out1, ref[0], atol=1e-3, rtol=1e-3), "single mismatch vs reference"

    print("KERNEL_OK")
</pallas_src>

<mosaic_0001>
module attributes {stable_mosaic.version = 11 : i64} {
  func.func @kernel(%arg0: i32, %arg1: memref<4x8x128xf32, #tpu.memory_space<vmem>>, %arg2: memref<9x128xf32, #tpu.memory_space<vmem>>, %arg3: memref<3x128x128xf32, #tpu.memory_space<vmem>>, %arg4: memref<4x8x128xf32, #tpu.memory_space<vmem>>) attributes {dimension_semantics = [#tpu.dimension_semantics<parallel>], iteration_bounds = array<i64: 1>, scalar_prefetch = 0 : i64, scratch_operands = 0 : i64, tpu.core_type = #tpu.core_type<tc>, window_params = [{transform_indices = @transform_0, window_bounds = array<i64: 4, 8, 128>}, {pipeline_mode = #tpu.pipeline_mode<synchronous>, transform_indices = @transform_1, window_bounds = array<i64: 9, 128>}, {pipeline_mode = #tpu.pipeline_mode<synchronous>, transform_indices = @transform_2, window_bounds = array<i64: 3, 128, 128>}, {transform_indices = @transform_3, window_bounds = array<i64: 4, 8, 128>}]} {
    %c0 = arith.constant 0 : index
    %c0_0 = arith.constant 0 : index
    %0 = vector.load %arg2[%c0, %c0_0] : memref<9x128xf32, #tpu.memory_space<vmem>>, vector<9x128xf32>
    %c0_1 = arith.constant 0 : index
    %c0_2 = arith.constant 0 : index
    %c0_3 = arith.constant 0 : index
    %1 = vector.load %arg1[%c0_1, %c0_2, %c0_3] : memref<4x8x128xf32, #tpu.memory_space<vmem>>, vector<4x8x128xf32>
    %2 = vector.extract_strided_slice %0 {offsets = [0, 0], sizes = [1, 128], strides = [1, 1]} : vector<9x128xf32> to vector<1x128xf32>
    %3 = vector.extract_strided_slice %0 {offsets = [1, 0], sizes = [1, 128], strides = [1, 1]} : vector<9x128xf32> to vector<1x128xf32>
    %4 = vector.extract_strided_slice %0 {offsets = [2, 0], sizes = [1, 128], strides = [1, 1]} : vector<9x128xf32> to vector<1x128xf32>
    %cst = arith.constant dense<0.000000e+00> : vector<4x128xf32>
    %5 = vector.multi_reduction <add>, %1, %cst [1] : vector<4x8x128xf32> to vector<4x128xf32>
    %6 = vector.shape_cast %5 : vector<4x128xf32> to vector<4x1x128xf32>
    %cst_4 = arith.constant 8.000000e+00 : f32
    %7 = vector.broadcast %cst_4 : f32 to vector<4x1x128xf32>
    %8 = arith.divf %6, %7 : vector<4x1x128xf32>
    %9 = vector.broadcast %8 : vector<4x1x128xf32> to vector<4x8x128xf32>
    %10 = arith.subf %1, %9 : vector<4x8x128xf32>
    %11 = arith.mulf %10, %10 : vector<4x8x128xf32>
    %cst_5 = arith.constant dense<0.000000e+00> : vector<4x128xf32>
    %12 = vector.multi_reduction <add>, %11, %cst_5 [1] : vector<4x8x128xf32> to vector<4x128xf32>
    %13 = vector.shape_cast %12 : vector<4x128xf32> to vector<4x1x128xf32>
    %cst_6 = arith.constant 8.000000e+00 : f32
    %14 = vector.broadcast %cst_6 : f32 to vector<4x1x128xf32>
    %15 = arith.divf %13, %14 : vector<4x1x128xf32>
    %cst_7 = arith.constant 9.99999974E-6 : f32
    %16 = vector.broadcast %cst_7 : f32 to vector<4x1x128xf32>
    %17 = arith.addf %15, %16 : vector<4x1x128xf32>
    %18 = math.rsqrt %17 : vector<4x1x128xf32>
    %19 = vector.shape_cast %2 : vector<1x128xf32> to vector<1x1x128xf32>
    %20 = vector.broadcast %19 : vector<1x1x128xf32> to vector<4x1x128xf32>
    %21 = arith.mulf %20, %18 : vector<4x1x128xf32>
    %22 = vector.broadcast %8 : vector<4x1x128xf32> to vector<4x8x128xf32>
    %23 = arith.subf %1, %22 : vector<4x8x128xf32>
    %24 = vector.broadcast %21 : vector<4x1x128xf32> to vector<4x8x128xf32>
    %25 = arith.mulf %23, %24 : vector<4x8x128xf32>
    %26 = vector.shape_cast %3 : vector<1x128xf32> to vector<1x1x128xf32>
    %27 = vector.broadcast %26 : vector<1x1x128xf32> to vector<4x8x128xf32>
    %28 = arith.addf %25, %27 : vector<4x8x128xf32>
    %29 = vector.shape_cast %28 : vector<4x8x128xf32> to vector<32x128xf32>
    %c0_8 = arith.constant 0 : index
    %c0_9 = arith.constant 0 : index
    %c0_10 = arith.constant 0 : index
    %30 = vector.load %arg3[%c0_8, %c0_9, %c0_10] : memref<3x128x128xf32, #tpu.memory_space<vmem>>, vector<1x128x128xf32>
    %31 = vector.shape_cast %30 : vector<1x128x128xf32> to vector<128x128xf32>
    %cst_11 = arith.constant dense<0.000000e+00> : vector<32x128xf32>
    %32 = tpu.matmul %29, %31, %cst_11 {dimension_numbers = #tpu.dot_dimension_numbers<[1], [0], [0], [1], [0, 0, 1, 1], [], []>} : vector<32x128xf32>, vector<128x128xf32>, vector<32x128xf32> -> vector<32x128xf32>
    %33 = vector.broadcast %4 : vector<1x128xf32> to vector<32x128xf32>
    %34 = arith.addf %32, %33 : vector<32x128xf32>
    %35 = vector.shape_cast %34 : vector<32x128xf32> to vector<4x8x128xf32>
    %cst_12 = arith.constant 0.000000e+00 : f32
    %36 = vector.broadcast %cst_12 : f32 to vector<4x8x128xf32>
    %37 = arith.maximumf %35, %36 : vector<4x8x128xf32>
    %38 = vector.extract_strided_slice %0 {offsets = [3, 0], sizes = [1, 128], strides = [1, 1]} : vector<9x128xf32> to vector<1x128xf32>
    %39 = vector.extract_strided_slice %0 {offsets = [4, 0], sizes = [1, 128], strides = [1, 1]} : vector<9x128xf32> to vector<1x128xf32>
    %40 = vector.extract_strided_slice %0 {offsets = [5, 0], sizes = [1, 128], strides = [1, 1]} : vector<9x128xf32> to vector<1x128xf32>
    %cst_13 = arith.constant dense<0.000000e+00> : vector<4x128xf32>
    %41 = vector.multi_reduction <add>, %37, %cst_13 [1] : vector<4x8x128xf32> to vector<4x128xf32>
    %42 = vector.shape_cast %41 : vector<4x128xf32> to vector<4x1x128xf32>
    %cst_14 = arith.constant 8.000000e+00 : f32
    %43 = vector.broadcast %cst_14 : f32 to vector<4x1x128xf32>
    %44 = arith.divf %42, %43 : vector<4x1x128xf32>
    %45 = vector.broadcast %44 : vector<4x1x128xf32> to vector<4x8x128xf32>
    %46 = arith.subf %37, %45 : vector<4x8x128xf32>
    %47 = arith.mulf %46, %46 : vector<4x8x128xf32>
    %cst_15 = arith.constant dense<0.000000e+00> : vector<4x128xf32>
    %48 = vector.multi_reduction <add>, %47, %cst_15 [1] : vector<4x8x128xf32> to vector<4x128xf32>
    %49 = vector.shape_cast %48 : vector<4x128xf32> to vector<4x1x128xf32>
    %cst_16 = arith.constant 8.000000e+00 : f32
    %50 = vector.broadcast %cst_16 : f32 to vector<4x1x128xf32>
    %51 = arith.divf %49, %50 : vector<4x1x128xf32>
    %cst_17 = arith.constant 9.99999974E-6 : f32
    %52 = vector.broadcast %cst_17 : f32 to vector<4x1x128xf32>
    %53 = arith.addf %51, %52 : vector<4x1x128xf32>
    %54 = math.rsqrt %53 : vector<4x1x128xf32>
    %55 = vector.shape_cast %38 : vector<1x128xf32> to vector<1x1x128xf32>
    %56 = vector.broadcast %55 : vector<1x1x128xf32> to vector<4x1x128xf32>
    %57 = arith.mulf %56, %54 : vector<4x1x128xf32>
    %58 = vector.broadcast %44 : vector<4x1x128xf32> to vector<4x8x128xf32>
    %59 = arith.subf %37, %58 : vector<4x8x128xf32>
    %60 = vector.broadcast %57 : vector<4x1x128xf32> to vector<4x8x128xf32>
    %61 = arith.mulf %59, %60 : vector<4x8x128xf32>
    %62 = vector.shape_cast %39 : vector<1x128xf32> to vector<1x1x128xf32>
    %63 = vector.broadcast %62 : vector<1x1x128xf32> to vector<4x8x128xf32>
    %64 = arith.addf %61, %63 : vector<4x8x128xf32>
    %65 = vector.shape_cast %64 : vector<4x8x128xf32> to vector<32x128xf32>
    %c1 = arith.constant 1 : index
    %c0_18 = arith.constant 0 : index
    %c0_19 = arith.constant 0 : index
    %66 = vector.load %arg3[%c1, %c0_18, %c0_19] : memref<3x128x128xf32, #tpu.memory_space<vmem>>, vector<1x128x128xf32>
    %67 = vector.shape_cast %66 : vector<1x128x128xf32> to vector<128x128xf32>
    %cst_20 = arith.constant dense<0.000000e+00> : vector<32x128xf32>
    %68 = tpu.matmul %65, %67, %cst_20 {dimension_numbers = #tpu.dot_dimension_numbers<[1], [0], [0], [1], [0, 0, 1, 1], [], []>} : vector<32x128xf32>, vector<128x128xf32>, vector<32x128xf32> -> vector<32x128xf32>
    %69 = vector.broadcast %40 : vector<1x128xf32> to vector<32x128xf32>
    %70 = arith.addf %68, %69 : vector<32x128xf32>
    %71 = vector.shape_cast %70 : vector<32x128xf32> to vector<4x8x128xf32>
    %cst_21 = arith.constant 0.000000e+00 : f32
    %72 = vector.broadcast %cst_21 : f32 to vector<4x8x128xf32>
    %73 = arith.maximumf %71, %72 : vector<4x8x128xf32>
    %74 = vector.extract_strided_slice %0 {offsets = [6, 0], sizes = [1, 128], strides = [1, 1]} : vector<9x128xf32> to vector<1x128xf32>
    %75 = vector.extract_strided_slice %0 {offsets = [7, 0], sizes = [1, 128], strides = [1, 1]} : vector<9x128xf32> to vector<1x128xf32>
    %76 = vector.extract_strided_slice %0 {offsets = [8, 0], sizes = [1, 128], strides = [1, 1]} : vector<9x128xf32> to vector<1x128xf32>
    %cst_22 = arith.constant dense<0.000000e+00> : vector<4x128xf32>
    %77 = vector.multi_reduction <add>, %73, %cst_22 [1] : vector<4x8x128xf32> to vector<4x128xf32>
    %78 = vector.shape_cast %77 : vector<4x128xf32> to vector<4x1x128xf32>
    %cst_23 = arith.constant 8.000000e+00 : f32
    %79 = vector.broadcast %cst_23 : f32 to vector<4x1x128xf32>
    %80 = arith.divf %78, %79 : vector<4x1x128xf32>
    %81 = vector.broadcast %80 : vector<4x1x128xf32> to vector<4x8x128xf32>
    %82 = arith.subf %73, %81 : vector<4x8x128xf32>
    %83 = arith.mulf %82, %82 : vector<4x8x128xf32>
    %cst_24 = arith.constant dense<0.000000e+00> : vector<4x128xf32>
    %84 = vector.multi_reduction <add>, %83, %cst_24 [1] : vector<4x8x128xf32> to vector<4x128xf32>
    %85 = vector.shape_cast %84 : vector<4x128xf32> to vector<4x1x128xf32>
    %cst_25 = arith.constant 8.000000e+00 : f32
    %86 = vector.broadcast %cst_25 : f32 to vector<4x1x128xf32>
    %87 = arith.divf %85, %86 : vector<4x1x128xf32>
    %cst_26 = arith.constant 9.99999974E-6 : f32
    %88 = vector.broadcast %cst_26 : f32 to vector<4x1x128xf32>
    %89 = arith.addf %87, %88 : vector<4x1x128xf32>
    %90 = math.rsqrt %89 : vector<4x1x128xf32>
    %91 = vector.shape_cast %74 : vector<1x128xf32> to vector<1x1x128xf32>
    %92 = vector.broadcast %91 : vector<1x1x128xf32> to vector<4x1x128xf32>
    %93 = arith.mulf %92, %90 : vector<4x1x128xf32>
    %94 = vector.broadcast %80 : vector<4x1x128xf32> to vector<4x8x128xf32>
    %95 = arith.subf %73, %94 : vector<4x8x128xf32>
    %96 = vector.broadcast %93 : vector<4x1x128xf32> to vector<4x8x128xf32>
    %97 = arith.mulf %95, %96 : vector<4x8x128xf32>
    %98 = vector.shape_cast %75 : vector<1x128xf32> to vector<1x1x128xf32>
    %99 = vector.broadcast %98 : vector<1x1x128xf32> to vector<4x8x128xf32>
    %100 = arith.addf %97, %99 : vector<4x8x128xf32>
    %101 = vector.shape_cast %100 : vector<4x8x128xf32> to vector<32x128xf32>
    %c2 = arith.constant 2 : index
    %c0_27 = arith.constant 0 : index
    %c0_28 = arith.constant 0 : index
    %102 = vector.load %arg3[%c2, %c0_27, %c0_28] : memref<3x128x128xf32, #tpu.memory_space<vmem>>, vector<1x128x128xf32>
    %103 = vector.shape_cast %102 : vector<1x128x128xf32> to vector<128x128xf32>
    %cst_29 = arith.constant dense<0.000000e+00> : vector<32x128xf32>
    %104 = tpu.matmul %101, %103, %cst_29 {dimension_numbers = #tpu.dot_dimension_numbers<[1], [0], [0], [1], [0, 0, 1, 1], [], []>} : vector<32x128xf32>, vector<128x128xf32>, vector<32x128xf32> -> vector<32x128xf32>
    %105 = vector.broadcast %76 : vector<1x128xf32> to vector<32x128xf32>
    %106 = arith.addf %104, %105 : vector<32x128xf32>
    %107 = vector.shape_cast %106 : vector<32x128xf32> to vector<4x8x128xf32>
    %c0_30 = arith.constant 0 : index
    %c0_31 = arith.constant 0 : index
    %c0_32 = arith.constant 0 : index
    %108 = vector.load %arg4[%c0_30, %c0_31, %c0_32] : memref<4x8x128xf32, #tpu.memory_space<vmem>>, vector<4x8x128xf32>
    tpu.vector_store %arg4[%c0_30, %c0_31, %c0_32], %107 {strides = array<i32>} : memref<4x8x128xf32, #tpu.memory_space<vmem>>, vector<4x8x128xf32>,
    return
  }
  func.func @transform_0(%arg0: i32) -> (i32, i32, i32) {
    %c0_i32 = arith.constant 0 : i32
    %c0_i32_0 = arith.constant 0 : i32
    %c0_i32_1 = arith.constant 0 : i32
    return %arg0, %c0_i32, %c0_i32_0 : i32, i32, i32
  }
  func.func @transform_1(%arg0: i32) -> (i32, i32) {
    %c0_i32 = arith.constant 0 : i32
    %c0_i32_0 = arith.constant 0 : i32
    %c0_i32_1 = arith.constant 0 : i32
    return %c0_i32, %c0_i32_0 : i32, i32
  }
  func.func @transform_2(%arg0: i32) -> (i32, i32, i32) {
    %c0_i32 = arith.constant 0 : i32
    %c0_i32_0 = arith.constant 0 : i32
    %c0_i32_1 = arith.constant 0 : i32
    %c0_i32_2 = arith.constant 0 : i32
    return %c0_i32, %c0_i32_0, %c0_i32_1 : i32, i32, i32
  }
  func.func @transform_3(%arg0: i32) -> (i32, i32, i32) {
    %c0_i32 = arith.constant 0 : i32
    %c0_i32_0 = arith.constant 0 : i32
    %c0_i32_1 = arith.constant 0 : i32
    return %arg0, %c0_i32, %c0_i32_0 : i32, i32, i32
  }
}

</mosaic_0001>

<bundles_post_ra>
// kernel: tpu_custom_call.1
= control target key start
LH: loop header
LB: loop body
LE: loop exit
PB: predicated region body
PF: predicated region fallthrough
CT: control target
= control target key end

     0   :  { %8 = vsyncpa [#allocation3], 0  ;;  %s1275_s0 = inlined_call_operand.hbm [shape: f32[4,8,128], index: 0, kind: input, shape index: {}]   ;;  %s1276_s1 = inlined_call_operand.hbm [shape: f32[9,128], index: 1, kind: input, shape index: {}]   ;;  %s1277_s2 = inlined_call_operand.hbm [shape: f32[3,128,128], index: 2, kind: input, shape index: {}]   ;;  %s1278_s3 = inlined_call_operand.hbm [shape: f32[4,8,128], index: 3, kind: output, shape index: {}]  }
   0x1   :  { %9 = vsyncpa [#allocation6], 0 }
   0x2   :  { %10 = vsyncpa [#allocation4], 0  ;;  %s1133_s12 = smov [#allocation5]   ;;  %s1134_s14 = smov [#allocation2]  }
   0x3   :  { %s28_s13 = sshll.u32 %s1133_s12, 4  ;;  %s16_s15 = sshll.u32 %s1134_s14, 4  ;;  %s29_s13 = int_to_ptr.vmem [resolvable:$true] %s28_s13  ;;  %s1159_s15 = int_to_ptr.vmem [resolvable:$true] %s16_s15 }
   0x4   :  { %s1039_s18 = scalar_lea.hbm %s1276_s1, 256 }
   0x5   :  { %p1040_p0 = scmp.ne.s32.totalorder %s1276_s1, %s1039_s18  ;;  %p1043_p1 = scmp.lt.u32.totalorder %s1039_s18, %s1276_s1 }
   0x7   :  { %p1045_p2 = pnand %p1043_p1, %p1040_p0 }
   0x9   :  { %1048 = shalt.err (!%p1045_p2)
}
   0xa   :  { %s1049_s23 = scalar_lea.vmem %s29_s13, 256  ;;  %p1054_p4 = scmp.lt.s32.totalorder %s29_s13, %s29_s13 }
   0xb   :  { %p1050_p3 = scmp.ne.s32.totalorder %s29_s13, %s1049_s23  ;;  %p1055_p5 = scmp.lt.s32.totalorder %s1049_s23, %s1049_s23 }
   0xd   :  { %p1056_p6 = por %p1055_p5, %p1054_p4 }
   0xf   :  { %p1057_p7 = pnand %p1056_p6, %p1050_p3 }
  0x11   :  { %1060 = shalt.err (!%p1057_p7)
}
  0x12   :  { %s1135_s24 = smov 128   ;;  %s1136_s25 = smov 8  }
  0x13   :  { %34 = dma.hbm_to_vmem [thread:$0]  %s1276_s1, 256, %s29_s13, [#allocation6], %s1135_s24, %s1135_s24, %s1136_s25  }
  0x14   :  { %s1061_s30 = scalar_lea.hbm %s1275_s0, 512 }
  0x15   :  { %p1062_p8 = scmp.ne.s32.totalorder %s1275_s0, %s1061_s30  ;;  %p1065_p9 = scmp.lt.u32.totalorder %s1061_s30, %s1275_s0 }
  0x17   :  { %p1067_p10 = pnand %p1065_p9, %p1062_p8 }
  0x19   :  { %1070 = shalt.err (!%p1067_p10)
}
  0x1a   :  { %s1071_s8 = scalar_lea.vmem %s1159_s15, 512  ;;  %p1076_p12 = scmp.lt.s32.totalorder %s1159_s15, %s1159_s15 }
  0x1b   :  { %p1072_p11 = scmp.ne.s32.totalorder %s1159_s15, %s1071_s8  ;;  %p1077_p13 = scmp.lt.s32.totalorder %s1071_s8, %s1071_s8 }
  0x1d   :  { %p1078_p0 = por %p1077_p13, %p1076_p12 }
  0x1f   :  { %p1079_p1 = pnand %p1078_p0, %p1072_p11 }
  0x21   :  { %1082 = shalt.err (!%p1079_p1)
}
  0x22   :  { %22 = dma.hbm_to_vmem [thread:$0]  %s1275_s0, 512, %s1159_s15, [#allocation3], %s1135_s24, %s1135_s24, %s1136_s25  }
  0x23   :  { %s1137_s10 = smov [#allocation7]   ;;  %s1083_s14 = scalar_lea.hbm %s1277_s2, 6144 }
  0x24   :  { %s40_s11 = sshll.u32 %s1137_s10, 4  ;;  %p1084_p2 = scmp.ne.s32.totalorder %s1277_s2, %s1083_s14  ;;  %s41_s11 = int_to_ptr.vmem [resolvable:$true] %s40_s11 }
  0x25   :  { %p1087_p3 = scmp.lt.u32.totalorder %s1083_s14, %s1277_s2 }
  0x27   :  { %p1089_p4 = pnand %p1087_p3, %p1084_p2 }
  0x29   :  { %1092 = shalt.err (!%p1089_p4)
}
  0x2a   :  { %s1093_s20 = scalar_lea.vmem %s41_s11, 6144  ;;  %p1098_p6 = scmp.lt.s32.totalorder %s41_s11, %s41_s11 }
  0x2b   :  { %p1094_p5 = scmp.ne.s32.totalorder %s41_s11, %s1093_s20  ;;  %p1099_p7 = scmp.lt.s32.totalorder %s1093_s20, %s1093_s20 }
  0x2d   :  { %p1100_p8 = por %p1099_p7, %p1098_p6 }
  0x2f   :  { %p1101_p9 = pnand %p1100_p8, %p1094_p5 }
  0x31   :  { %1104 = shalt.err (!%p1101_p9)
}
  0x32   :  { %46 = dma.hbm_to_vmem [thread:$0]  %s1277_s2, 6144, %s41_s11, [#allocation6], %s1135_s24, %s1135_s24, %s1136_s25  }
  0x33   :  { %1127 = dma.done.wait [#allocation3], 512  }
  0x34   :  { %1128 = vsyncadd [#allocation3], 4294966784 }
  0x35   :  { %1129 = dma.done.wait [#allocation6], 6400  }
  0x36   :  { %1130 = vsyncadd [#allocation6], 4294960896  ;;  %v167_v0 = vld [vmem:[#allocation7] sm:$0xff]  ;;  %v168_v1 = vld [vmem:[#allocation7 + $0x8] sm:$0xff]  ;;  %s1138_s2 = smov [#allocation8]  }
  0x37   :  { %v169_v2 = vld [vmem:[#allocation7 + $0x10] sm:$0xff]  ;;  %v897_v3 = vpack.c.bf16 %v168_v1, %v167_v0  ;;  %v170_v4 = vld [vmem:[#allocation7 + $0x18] sm:$0xff]  ;;  %v171_v6 = vld [vmem:[#allocation7 + $0x20] sm:$0xff]  ;;  %s709_s21 = sshll.u32 %s1138_s2, 4  ;;  %s710_s21 = int_to_ptr.vmem [resolvable:$true] %s709_s21 }
  0x38   :  { %v901_v5 = vpack.c.bf16 %v170_v4, %v169_v2  ;;  %v172_v7 = vld [vmem:[#allocation7 + $0x28] sm:$0xff]  ;;  %v173_v9 = vld [vmem:[#allocation7 + $0x30] sm:$0xff]  ;;  %v174_v10 = vld [vmem:[#allocation7 + $0x38] sm:$0xff]  ;;  %s1105_s22 = scalar_lea.vmem %s710_s21, 512  ;;  %p1110_p11 = scmp.lt.s32.totalorder %s710_s21, %s710_s21 }
  0x39   :  { %898 = vmatprep.subr.bf16.mxu0 %v897_v3  ;;  %v905_v8 = vpack.c.bf16 %v172_v7, %v171_v6  ;;  %v58_v11 = vld [vmem:[#allocation2] sm:$0xff]  ;;  %v59_v13 = vld [vmem:[#allocation2 + $0x8] sm:$0xff]  ;;  %v60_v14 = vld [vmem:[#allocation2 + $0x10] sm:$0xff]  ;;  %v909_v20 = vpack.c.bf16 %v174_v10, %v173_v9  ;;  %p1106_p10 = scmp.ne.s32.totalorder %s710_s21, %s1105_s22  ;;  %p1111_p12 = scmp.lt.s32.totalorder %s1105_s22, %s1105_s22 }
  0x3a   :  { %900 = vmatpush3.bf16.msra.mxu0 %v897_v3  ;;  %v62_v12 = vrot.slane %v58_v11, 4  ;;  %v61_v15 = vld [vmem:[#allocation2 + $0x18] sm:$0xff]  ;;  %v68_v16 = vrot.slane %v59_v13, 4  ;;  %v74_v17 = vrot.slane %v60_v14, 4  ;;  %v175_v24 = vld [vmem:[#allocation7 + $0x40] sm:$0xff]  ;;  %v177_v35 = vld [vmem:[#allocation7 + $0x50] sm:$0xff] }
  0x3b   :  { %902 = vmatprep.subr.bf16.mxu0 %v901_v5  ;;  %v80_v18 = vrot.slane %v61_v15, 4  ;;  %v176_v25 = vld [vmem:[#allocation7 + $0x48] sm:$0xff]  ;;  %v178_v36 = vld [vmem:[#allocation7 + $0x58] sm:$0xff]  ;;  %v179_v46 = vld [vmem:[#allocation7 + $0x60] sm:$0xff]  ;;  %p1112_p13 = por %p1111_p12, %p1110_p11 }
  0x3c   :  { %v63_v19 = vadd.f32 %v62_v12, %v58_v11  ;;  %v69_v21 = vadd.f32 %v68_v16, %v59_v13  ;;  %v75_v22 = vadd.f32 %v74_v17, %v60_v14  ;;  %v913_v31 = vpack.c.bf16 %v176_v25, %v175_v24  ;;  %v180_v47 = vld [vmem:[#allocation7 + $0x68] sm:$0xff]  ;;  %v181_v57 = vld [vmem:[#allocation7 + $0x70] sm:$0xff]  ;;  %v182_v58 = vld [vmem:[#allocation7 + $0x78] sm:$0xff] }
  0x3d   :  { %v81_v23 = vadd.f32 %v80_v18, %v61_v15  ;;  %v917_v42 = vpack.c.bf16 %v178_v36, %v177_v35  ;;  %v921_v53 = vpack.c.bf16 %v180_v47, %v179_v46  ;;  %v925_v0 = vpack.c.bf16 %v182_v58, %v181_v57  ;;  %p1113_p0 = pnand %p1112_p13, %p1106_p10 }
  0x3e   :  { %904 = vmatpush3.bf16.msra.mxu0 %v901_v5  ;;  %v64_v26 = vrot.slane %v63_v19, 2  ;;  %v70_v27 = vrot.slane %v69_v21, 2  ;;  %v76_v28 = vrot.slane %v75_v22, 2 }
  0x3f   :  { %906 = vmatprep.subr.bf16.mxu0 %v905_v8  ;;  %v82_v29 = vrot.slane %v81_v23, 2 }
  0x40   :  { %v65_v30 = vadd.f32 %v64_v26, %v63_v19  ;;  %v71_v32 = vadd.f32 %v70_v27, %v69_v21  ;;  %v77_v33 = vadd.f32 %v76_v28, %v75_v22 }
  0x41   :  { %v83_v34 = vadd.f32 %v82_v29, %v81_v23 }
  0x42   :  { %908 = vmatpush3.bf16.msra.mxu0 %v905_v8  ;;  %v66_v37 = vrot.slane %v65_v30, 1  ;;  %v72_v38 = vrot.slane %v71_v32, 1  ;;  %v78_v39 = vrot.slane %v77_v33, 1 }
  0x43   :  { %910 = vmatprep.subr.bf16.mxu0 %v909_v20  ;;  %v84_v40 = vrot.slane %v83_v34, 1 }
  0x44   :  { %v67_v41 = vadd.f32 %v66_v37, %v65_v30  ;;  %v73_v43 = vadd.f32 %v72_v38, %v71_v32  ;;  %v79_v44 = vadd.f32 %v78_v39, %v77_v33  ;;  %v139_v32 = vlaneseq }
  0x45   :  { %v85_v45 = vadd.f32 %v84_v40, %v83_v34  ;;  %v1229_v34 = vld [vmem:[#allocation5] sm:$0xff] }
  0x46   :  { %912 = vmatpush3.bf16.msra.mxu0 %v909_v20  ;;  %v87_v48 = vmul.f32 0.125, %v67_v41  ;;  %v88_v49 = vmul.f32 0.125, %v73_v43  ;;  %v89_v50 = vmul.f32 0.125, %v79_v44  ;;  %v1227_v33 = vshrl.u32 %v139_v32, 7 }
  0x47   :  { %914 = vmatprep.subr.bf16.mxu0 %v913_v31  ;;  %v90_v51 = vmul.f32 0.125, %v85_v45 }
  0x48   :  { %v1211_v52 = vsub.f32 %v58_v11, %v87_v48  ;;  %v1213_v54 = vsub.f32 %v59_v13, %v88_v49  ;;  %v1215_v55 = vsub.f32 %v60_v14, %v89_v50  ;;  %v141_v35 = vsub.s32 0, %v1227_v33 }
  0x49   :  { %v1217_v56 = vsub.f32 %v61_v15, %v90_v51  ;;  %v161_v36 = vsub.s32 1, %v1227_v33 }
  0x4a   :  { %916 = vmatpush3.bf16.msra.mxu0 %v913_v31  ;;  %v95_v59 = vmul.f32 %v1211_v52, %v1211_v52  ;;  %v96_v60 = vmul.f32 %v1213_v54, %v1213_v54  ;;  %v97_v61 = vmul.f32 %v1215_v55, %v1215_v55 }
  0x4b   :  { %918 = vmatprep.subr.bf16.mxu0 %v917_v42  ;;  %v98_v62 = vmul.f32 %v1217_v56, %v1217_v56  ;;  %v162_v44 = vrot.slane %v1229_v34, %v161_v36 }
  0x4c   :  { %v99_v63 = vrot.slane %v95_v59, 4  ;;  %v105_v1 = vrot.slane %v96_v60, 4  ;;  %v111_v2 = vrot.slane %v97_v61, 4 }
  0x4d   :  { %v117_v3 = vrot.slane %v98_v62, 4 }
  0x4e   :  { %920 = vmatpush3.bf16.msra.mxu0 %v917_v42  ;;  %v100_v4 = vadd.f32 %v99_v63, %v95_v59  ;;  %v106_v5 = vadd.f32 %v105_v1, %v96_v60  ;;  %v112_v6 = vadd.f32 %v111_v2, %v97_v61  ;;  %v382_v63 = vld [vmem:[#allocation7 + $0x88] sm:$0xff] }
  0x4f   :  { %922 = vmatprep.subr.bf16.mxu0 %v921_v53  ;;  %v118_v7 = vadd.f32 %v117_v3, %v98_v62  ;;  %v381_v62 = vld [vmem:[#allocation7 + $0x80] sm:$0xff]  ;;  %v386_v2 = vld [vmem:[#allocation7 + $0xa8] sm:$0xff] }
  0x50   :  { %v101_v8 = vrot.slane %v100_v4, 2  ;;  %v107_v9 = vrot.slane %v106_v5, 2  ;;  %v113_v10 = vrot.slane %v112_v6, 2 }
  0x51   :  { %v119_v11 = vrot.slane %v118_v7, 2 }
  0x52   :  { %924 = vmatpush3.bf16.msra.mxu0 %v921_v53  ;;  %v102_v12 = vadd.f32 %v101_v8, %v100_v4  ;;  %v108_v13 = vadd.f32 %v107_v9, %v106_v5  ;;  %v114_v14 = vadd.f32 %v113_v10, %v112_v6  ;;  %v388_v4 = vld [vmem:[#allocation7 + $0xb8] sm:$0xff]  ;;  %v389_v6 = vld [vmem:[#allocation7 + $0xc0] sm:$0xff]  ;;  %v391_v9 = vld [vmem:[#allocation7 + $0xd0] sm:$0xff] }
  0x53   :  { %926 = vmatprep.subr.bf16.mxu0 %v925_v0  ;;  %v120_v15 = vadd.f32 %v119_v11, %v118_v7  ;;  %v390_v7 = vld [vmem:[#allocation7 + $0xc8] sm:$0xff]  ;;  %v392_v10 = vld [vmem:[#allocation7 + $0xd8] sm:$0xff]  ;;  %v393_v11 = vld [vmem:[#allocation7 + $0xe0] sm:$0xff] }
  0x54   :  { %v103_v16 = vrot.slane %v102_v12, 1  ;;  %v109_v17 = vrot.slane %v108_v13, 1  ;;  %v115_v18 = vrot.slane %v114_v14, 1  ;;  %v945_v8 = vpack.c.bf16 %v390_v7, %v389_v6 }
  0x55   :  { %v121_v19 = vrot.slane %v120_v15, 1 }
  0x56   :  { %928 = vmatpush3.bf16.msra.mxu0 %v925_v0  ;;  %v104_v20 = vadd.f32 %v103_v16, %v102_v12  ;;  %v110_v21 = vadd.f32 %v109_v17, %v108_v13  ;;  %v116_v22 = vadd.f32 %v115_v18, %v114_v14  ;;  %v929_v0 = vpack.c.bf16 %v382_v63, %v381_v62  ;;  %v394_v13 = vld [vmem:[#allocation7 + $0xe8] sm:$0xff]  ;;  %v396_v16 = vld [vmem:[#allocation7 + $0xf8] sm:$0xff] }
  0x57   :  { %v122_v23 = vadd.f32 %v121_v19, %v120_v15  ;;  %v949_v12 = vpack.c.bf16 %v392_v10, %v391_v9  ;;  %v953_v14 = vpack.c.bf16 %v394_v13, %v393_v11  ;;  %v395_v15 = vld [vmem:[#allocation7 + $0xf0] sm:$0xff]  ;;  %v185_v18 = vsub.s32 2, %v1227_v33 }
  0x58   :  { %v123_v24 = vmul.f32 0.125, %v104_v20  ;;  %v124_v25 = vmul.f32 0.125, %v110_v21  ;;  %v125_v26 = vmul.f32 0.125, %v116_v22  ;;  %930 = vmatprep.subr.bf16.mxu1 %v929_v0  ;;  %v957_v17 = vpack.c.bf16 %v396_v16, %v395_v15 }
  0x59   :  { %v126_v27 = vmul.f32 0.125, %v122_v23  ;;  %932 = vmatpush3.bf16.msra.mxu1 %v929_v0  ;;  %v186_v19 = vrot.slane %v1229_v34, %v185_v18 }
  0x5a   :  { %v127_v28 = vadd.f32 1e-05, %v123_v24  ;;  %v128_v29 = vadd.f32 1e-05, %v124_v25  ;;  %v129_v30 = vadd.f32 1e-05, %v125_v26 }
  0x5b   :  { %v130_v31 = vadd.f32 1e-05, %v126_v27 }
  0x5c   :  { %1015 = vrsqrt.f32 %v127_v28 }
  0x5d   :  { %1017 = vrsqrt.f32 %v128_v29 }
  0x5e   :  { %1019 = vrsqrt.f32 %v129_v30 }
  0x5f   :  { %1021 = vrsqrt.f32 %v130_v31 }
  0x66   :  { %v1016_v37 = vpop.eup %1015 }
  0x67   :  { %v1018_v38 = vpop.eup %1017  ;;  %v135_v39 = vmul.f32 %v1016_v37, %v1229_v34 }
  0x68   :  { %v1020_v40 = vpop.eup %1019  ;;  %v136_v41 = vmul.f32 %v1018_v38, %v1229_v34 }
  0x69   :  { %v1022_v42 = vpop.eup %1021  ;;  %v142_v43 = vrot.slane %v135_v39, %v141_v35  ;;  %v137_v45 = vmul.f32 %v1020_v40, %v1229_v34 }
  0x6a   :  { %v146_v46 = vrot.slane %v136_v41, %v141_v35  ;;  %v138_v47 = vmul.f32 %v1022_v42, %v1229_v34 }
  0x6b   :  { %v155_v48 = vmul.f32 %v142_v43, %v1211_v52  ;;  %v150_v49 = vrot.slane %v137_v45, %v141_v35  ;;  %v383_v52 = vld [vmem:[#allocation7 + $0x90] sm:$0xff] }
  0x6c   :  { %v156_v50 = vmul.f32 %v146_v46, %v1213_v54  ;;  %v154_v51 = vrot.slane %v138_v47, %v141_v35  ;;  %v384_v54 = vld [vmem:[#allocation7 + $0x98] sm:$0xff] }
  0x6d   :  { %v163_v53 = vadd.f32 %v162_v44, %v155_v48  ;;  %v157_v57 = vmul.f32 %v150_v49, %v1215_v55  ;;  %v933_v1 = vpack.c.bf16 %v384_v54, %v383_v52  ;;  %v385_v55 = vld [vmem:[#allocation7 + $0xa0] sm:$0xff] }
  0x6e   :  { %v164_v58 = vadd.f32 %v162_v44, %v156_v50  ;;  %v158_v59 = vmul.f32 %v154_v51, %v1217_v56  ;;  %v937_v3 = vpack.c.bf16 %v386_v2, %v385_v55  ;;  %v387_v56 = vld [vmem:[#allocation7 + $0xb0] sm:$0xff] }
  0x6f   :  { %815 = vmatprep.mubr.f32.mxu0 %v163_v53  ;;  %v165_v60 = vadd.f32 %v162_v44, %v157_v57  ;;  %934 = vmatprep.subr.bf16.mxu1 %v933_v1  ;;  %v941_v5 = vpack.c.bf16 %v388_v4, %v387_v56 }
  0x70   :  { %816 = vmatmul.mubr.f32.vlgmr.msra.gmra.mrb[0].mxu0 %v164_v58  ;;  %v166_v61 = vadd.f32 %v162_v44, %v158_v59  ;;  %936 = vmatpush3.bf16.msra.mxu1 %v933_v1 }
  0x71   :  { %818 = vmatprep.mubr.f32.mxu0 %v165_v60  ;;  %938 = vmatprep.subr.bf16.mxu1 %v937_v3 }
  0x74   :  { %819 = vmatmul.mubr.f32.gmra.mrb[2].mxu0 %v166_v61  ;;  %940 = vmatpush3.bf16.msra.mxu1 %v937_v3 }
  0x75   :  { %942 = vmatprep.subr.bf16.mxu1 %v941_v5 }
  0x78   :  { %944 = vmatpush3.bf16.msra.mxu1 %v941_v5 }
  0x79   :  { %946 = vmatprep.subr.bf16.mxu1 %v945_v8 }
  0x7c   :  { %948 = vmatpush3.bf16.msra.mxu1 %v945_v8 }
  0x7d   :  { %950 = vmatprep.subr.bf16.mxu1 %v949_v12 }
  0x80   :  { %952 = vmatpush3.bf16.msra.mxu1 %v949_v12 }
  0x81   :  { %954 = vmatprep.subr.bf16.mxu1 %v953_v14 }
  0x84   :  { %956 = vmatpush3.bf16.msra.mxu1 %v953_v14 }
  0x85   :  { %958 = vmatprep.subr.bf16.mxu1 %v957_v17 }
  0x88   :  { %960 = vmatpush3.bf16.msra.mxu1 %v957_v17 }
 0x143   :  { %v817_v20 = vpop.f32.mrb[0].mxu0 }
 0x144   :  { %v259_v21 = vadd.f32 %v817_v20, %v186_v19  ;;  %v253_v22 = vpop.f32.mrb[1].mxu0 }
 0x145   :  { %v254_v23 = vadd.f32 %v253_v22, %v186_v19 }
 0x146   :  { %v273_v24 = vmax.f32 %v259_v21, 0.0 }
 0x147   :  { %v272_v25 = vmax.f32 %v254_v23, 0.0  ;;  %v820_v26 = vpop.f32.mrb[2].mxu0 }
 0x148   :  { %v282_v27 = vrot.slane %v273_v24, 4  ;;  %v269_v28 = vadd.f32 %v820_v26, %v186_v19  ;;  %v263_v29 = vpop.f32.mrb[3].mxu0 }
 0x149   :  { %v276_v30 = vrot.slane %v272_v25, 4  ;;  %v264_v31 = vadd.f32 %v263_v29, %v186_v19 }
 0x14a   :  { %v283_v32 = vadd.f32 %v282_v27, %v273_v24  ;;  %v275_v35 = vmax.f32 %v269_v28, 0.0 }
 0x14b   :  { %v277_v36 = vadd.f32 %v276_v30, %v272_v25  ;;  %v274_v37 = vmax.f32 %v264_v31, 0.0 }
 0x14c   :  { %v284_v38 = vrot.slane %v283_v32, 2  ;;  %v294_v39 = vrot.slane %v275_v35, 4 }
 0x14d   :  { %v278_v40 = vrot.slane %v277_v36, 2  ;;  %v288_v41 = vrot.slane %v274_v37, 4 }
 0x14e   :  { %v285_v42 = vadd.f32 %v284_v38, %v283_v32  ;;  %v295_v43 = vadd.f32 %v294_v39, %v275_v35 }
 0x14f   :  { %v279_v44 = vadd.f32 %v278_v40, %v277_v36  ;;  %v289_v45 = vadd.f32 %v288_v41, %v274_v37  ;;  %v354_v40 = vsub.s32 3, %v1227_v33 }
 0x150   :  { %v286_v46 = vrot.slane %v285_v42, 1  ;;  %v296_v47 = vrot.slane %v295_v43, 2 }
 0x151   :  { %v290_v48 = vrot.slane %v289_v45, 2  ;;  %v280_v49 = vrot.slane %v279_v44, 1 }
 0x152   :  { %v287_v50 = vadd.f32 %v286_v46, %v285_v42  ;;  %v297_v51 = vadd.f32 %v296_v47, %v295_v43  ;;  %v374_v42 = vsub.s32 4, %v1227_v33 }
 0x153   :  { %v291_v53 = vadd.f32 %v290_v48, %v289_v45  ;;  %v281_v57 = vadd.f32 %v280_v49, %v279_v44 }
 0x154   :  { %v301_v58 = vmul.f32 0.125, %v287_v50  ;;  %v298_v59 = vrot.slane %v297_v51, 1  ;;  %v375_v49 = vrot.slane %v1229_v34, %v374_v42 }
 0x155   :  { %v292_v60 = vrot.slane %v291_v53, 1  ;;  %v300_v61 = vmul.f32 0.125, %v281_v57 }
 0x156   :  { %v305_v62 = vsub.f32 %v273_v24, %v301_v58  ;;  %v299_v63 = vadd.f32 %v298_v59, %v297_v51 }
 0x157   :  { %v293_v0 = vadd.f32 %v292_v60, %v291_v53  ;;  %v304_v52 = vsub.f32 %v272_v25, %v300_v61 }
 0x158   :  { %v309_v54 = vmul.f32 %v305_v62, %v305_v62  ;;  %v303_v1 = vmul.f32 0.125, %v299_v63 }
 0x159   :  { %v302_v55 = vmul.f32 0.125, %v293_v0  ;;  %v308_v2 = vmul.f32 %v304_v52, %v304_v52 }
 0x15a   :  { %v318_v3 = vrot.slane %v309_v54, 4  ;;  %v307_v56 = vsub.f32 %v275_v35, %v303_v1 }
 0x15b   :  { %v306_v4 = vsub.f32 %v274_v37, %v302_v55  ;;  %v312_v5 = vrot.slane %v308_v2, 4 }
 0x15c   :  { %v319_v6 = vadd.f32 %v318_v3, %v309_v54  ;;  %v311_v7 = vmul.f32 %v307_v56, %v307_v56  ;;  %v596_v3 = vld [vmem:[#allocation7 + $0x108] sm:$0xff] }
 0x15d   :  { %v310_v8 = vmul.f32 %v306_v4, %v306_v4  ;;  %v313_v9 = vadd.f32 %v312_v5, %v308_v2  ;;  %v595_v2 = vld [vmem:[#allocation7 + $0x100] sm:$0xff]  ;;  %v598_v5 = vld [vmem:[#allocation7 + $0x118] sm:$0xff] }
 0x15e   :  { %v320_v10 = vrot.slane %v319_v6, 2  ;;  %v330_v11 = vrot.slane %v311_v7, 4 }
 0x15f   :  { %v324_v12 = vrot.slane %v310_v8, 4  ;;  %v314_v13 = vrot.slane %v313_v9, 2 }
 0x160   :  { %v321_v14 = vadd.f32 %v320_v10, %v319_v6  ;;  %v331_v15 = vadd.f32 %v330_v11, %v311_v7  ;;  %v603_v11 = vld [vmem:[#allocation7 + $0x140] sm:$0xff] }
 0x161   :  { %v325_v16 = vadd.f32 %v324_v12, %v310_v8  ;;  %v315_v17 = vadd.f32 %v314_v13, %v313_v9  ;;  %v601_v8 = vld [vmem:[#allocation7 + $0x130] sm:$0xff]  ;;  %v602_v9 = vld [vmem:[#allocation7 + $0x138] sm:$0xff]  ;;  %v604_v12 = vld [vmem:[#allocation7 + $0x148] sm:$0xff] }
 0x162   :  { %v322_v18 = vrot.slane %v321_v14, 1  ;;  %v332_v19 = vrot.slane %v331_v15, 2  ;;  %v973_v10 = vpack.c.bf16 %v602_v9, %v601_v8  ;;  %v977_v13 = vpack.c.bf16 %v604_v12, %v603_v11 }
 0x163   :  { %v326_v20 = vrot.slane %v325_v16, 2  ;;  %v316_v21 = vrot.slane %v315_v17, 1 }
 0x164   :  { %v323_v22 = vadd.f32 %v322_v18, %v321_v14  ;;  %v333_v23 = vadd.f32 %v332_v19, %v331_v15  ;;  %v605_v14 = vld [vmem:[#allocation7 + $0x150] sm:$0xff]  ;;  %v606_v15 = vld [vmem:[#allocation7 + $0x158] sm:$0xff]  ;;  %v608_v18 = vld [vmem:[#allocation7 + $0x168] sm:$0xff] }
 0x165   :  { %v327_v24 = vadd.f32 %v326_v20, %v325_v16  ;;  %v317_v25 = vadd.f32 %v316_v21, %v315_v17  ;;  %v981_v16 = vpack.c.bf16 %v606_v15, %v605_v14  ;;  %v607_v17 = vld [vmem:[#allocation7 + $0x160] sm:$0xff]  ;;  %v609_v20 = vld [vmem:[#allocation7 + $0x170] sm:$0xff]  ;;  %v610_v21 = vld [vmem:[#allocation7 + $0x178] sm:$0xff] }
 0x166   :  { %v337_v26 = vmul.f32 0.125, %v323_v22  ;;  %v334_v27 = vrot.slane %v333_v23, 1  ;;  %v985_v19 = vpack.c.bf16 %v608_v18, %v607_v17  ;;  %v989_v22 = vpack.c.bf16 %v610_v21, %v609_v20 }
 0x167   :  { %v328_v28 = vrot.slane %v327_v24, 1  ;;  %v336_v29 = vmul.f32 0.125, %v317_v25 }
 0x168   :  { %v341_v30 = vadd.f32 1e-05, %v337_v26  ;;  %v335_v31 = vadd.f32 %v334_v27, %v333_v23  ;;  %v399_v23 = vsub.s32 5, %v1227_v33 }
 0x169   :  { %v329_v32 = vadd.f32 %v328_v28, %v327_v24  ;;  %v340_v35 = vadd.f32 1e-05, %v336_v29 }
 0x16a   :  { %1023 = vrsqrt.f32 %v341_v30  ;;  %v339_v36 = vmul.f32 0.125, %v335_v31  ;;  %v400_v24 = vrot.slane %v1229_v34, %v399_v23 }
 0x16b   :  { %v338_v37 = vmul.f32 0.125, %v329_v32  ;;  %1025 = vrsqrt.f32 %v340_v35 }
 0x16c   :  { %v343_v38 = vadd.f32 1e-05, %v339_v36 }
 0x16d   :  { %v342_v39 = vadd.f32 1e-05, %v338_v37 }
 0x16e   :  { %1027 = vrsqrt.f32 %v343_v38 }
 0x16f   :  { %1029 = vrsqrt.f32 %v342_v39 }
 0x174   :  { %v1024_v41 = vpop.eup %1023 }
 0x175   :  { %v1026_v43 = vpop.eup %1025  ;;  %v349_v44 = vmul.f32 %v1024_v41, %v1229_v34 }
 0x176   :  { %v348_v45 = vmul.f32 %v1026_v43, %v1229_v34 }
 0x177   :  { %v359_v46 = vrot.slane %v349_v44, %v354_v40 }
 0x178   :  { %v1028_v47 = vpop.eup %1027  ;;  %v355_v48 = vrot.slane %v348_v45, %v354_v40 }
 0x179   :  { %v1030_v50 = vpop.eup %1029  ;;  %v369_v51 = vmul.f32 %v359_v46, %v305_v62  ;;  %v351_v53 = vmul.f32 %v1028_v47, %v1229_v34  ;;  %v961_v62 = vpack.c.bf16 %v596_v3, %v595_v2 }
 0x17a   :  { %v368_v57 = vmul.f32 %v355_v48, %v304_v52  ;;  %v350_v58 = vmul.f32 %v1030_v50, %v1229_v34  ;;  %v597_v52 = vld [vmem:[#allocation7 + $0x110] sm:$0xff] }
 0x17b   :  { %v367_v59 = vrot.slane %v351_v53, %v354_v40  ;;  %v377_v63 = vadd.f32 %v375_v49, %v369_v51  ;;  %962 = vmatprep.subr.bf16.mxu0 %v961_v62  ;;  %993 = vmatprep.subr.bf16.mxu1 %v961_v62  ;;  %v965_v6 = vpack.c.bf16 %v598_v5, %v597_v52 }
 0x17c   :  { %v376_v60 = vadd.f32 %v375_v49, %v368_v57  ;;  %v363_v61 = vrot.slane %v350_v58, %v354_v40  ;;  %964 = vmatpush3.bf16.msra.mxu0 %v961_v62 }
 0x17d   :  { %v371_v0 = vmul.f32 %v367_v59, %v307_v56  ;;  %966 = vmatprep.subr.bf16.mxu0 %v965_v6  ;;  %v599_v56 = vld [vmem:[#allocation7 + $0x120] sm:$0xff] }
 0x17e   :  { %853 = vmatprep.mubr.f32.mxu1 %v376_v60  ;;  %v370_v54 = vmul.f32 %v363_v61, %v306_v4  ;;  %v600_v4 = vld [vmem:[#allocation7 + $0x128] sm:$0xff] }
 0x17f   :  { %854 = vmatmul.mubr.f32.vlgmr.msra.gmra.mrb[0].mxu1 %v377_v63  ;;  %v379_v55 = vadd.f32 %v375_v49, %v371_v0  ;;  %v969_v7 = vpack.c.bf16 %v600_v4, %v599_v56 }
 0x180   :  { %v378_v1 = vadd.f32 %v375_v49, %v370_v54  ;;  %1001 = vmatpush3.bf16.msra.mxu1 %v961_v62  ;;  %968 = vmatpush3.bf16.msra.mxu0 %v965_v6 }
 0x181   :  { %994 = vmatprep.subr.bf16.mxu1 %v965_v6  ;;  %970 = vmatprep.subr.bf16.mxu0 %v969_v7 }
 0x182   :  { %856 = vmatprep.mubr.f32.mxu1 %v378_v1 }
 0x183   :  { %857 = vmatmul.mubr.f32.gmra.mrb[2].mxu1 %v379_v55 }
 0x184   :  { %1002 = vmatpush3.bf16.msra.mxu1 %v965_v6  ;;  %972 = vmatpush3.bf16.msra.mxu0 %v969_v7 }
 0x185   :  { %995 = vmatprep.subr.bf16.mxu1 %v969_v7  ;;  %974 = vmatprep.subr.bf16.mxu0 %v973_v10 }
 0x188   :  { %1003 = vmatpush3.bf16.msra.mxu1 %v969_v7  ;;  %976 = vmatpush3.bf16.msra.mxu0 %v973_v10 }
 0x189   :  { %996 = vmatprep.subr.bf16.mxu1 %v973_v10  ;;  %978 = vmatprep.subr.bf16.mxu0 %v977_v13 }
 0x18c   :  { %1004 = vmatpush3.bf16.msra.mxu1 %v973_v10  ;;  %980 = vmatpush3.bf16.msra.mxu0 %v977_v13 }
 0x18d   :  { %997 = vmatprep.subr.bf16.mxu1 %v977_v13  ;;  %982 = vmatprep.subr.bf16.mxu0 %v981_v16 }
 0x190   :  { %1005 = vmatpush3.bf16.msra.mxu1 %v977_v13  ;;  %984 = vmatpush3.bf16.msra.mxu0 %v981_v16 }
 0x191   :  { %998 = vmatprep.subr.bf16.mxu1 %v981_v16  ;;  %986 = vmatprep.subr.bf16.mxu0 %v985_v19 }
 0x194   :  { %1006 = vmatpush3.bf16.msra.mxu1 %v981_v16  ;;  %988 = vmatpush3.bf16.msra.mxu0 %v985_v19 }
 0x195   :  { %999 = vmatprep.subr.bf16.mxu1 %v985_v19  ;;  %990 = vmatprep.subr.bf16.mxu0 %v989_v22 }
 0x198   :  { %1007 = vmatpush3.bf16.msra.mxu1 %v985_v19  ;;  %992 = vmatpush3.bf16.msra.mxu0 %v989_v22 }
 0x199   :  { %1000 = vmatprep.subr.bf16.mxu1 %v989_v22 }
 0x19c   :  { %1008 = vmatpush3.bf16.msra.mxu1 %v989_v22 }
 0x252   :  { %v855_v25 = vpop.f32.mrb[0].mxu1 }
 0x253   :  { %v473_v26 = vadd.f32 %v855_v25, %v400_v24  ;;  %v467_v27 = vpop.f32.mrb[1].mxu1 }
 0x254   :  { %v468_v28 = vadd.f32 %v467_v27, %v400_v24 }
 0x255   :  { %v487_v29 = vmax.f32 %v473_v26, 0.0 }
 0x256   :  { %v486_v30 = vmax.f32 %v468_v28, 0.0  ;;  %v858_v31 = vpop.f32.mrb[2].mxu1 }
 0x257   :  { %v496_v32 = vrot.slane %v487_v29, 4  ;;  %v483_v35 = vadd.f32 %v858_v31, %v400_v24  ;;  %v477_v36 = vpop.f32.mrb[3].mxu1 }
 0x258   :  { %v490_v37 = vrot.slane %v486_v30, 4  ;;  %v478_v38 = vadd.f32 %v477_v36, %v400_v24 }
 0x259   :  { %v497_v39 = vadd.f32 %v496_v32, %v487_v29  ;;  %v489_v40 = vmax.f32 %v483_v35, 0.0 }
 0x25a   :  { %v491_v41 = vadd.f32 %v490_v37, %v486_v30  ;;  %v488_v42 = vmax.f32 %v478_v38, 0.0 }
 0x25b   :  { %v498_v43 = vrot.slane %v497_v39, 2  ;;  %v508_v44 = vrot.slane %v489_v40, 4 }
 0x25c   :  { %v492_v45 = vrot.slane %v491_v41, 2  ;;  %v502_v46 = vrot.slane %v488_v42, 4 }
 0x25d   :  { %v499_v47 = vadd.f32 %v498_v43, %v497_v39  ;;  %v509_v48 = vadd.f32 %v508_v44, %v489_v40 }
 0x25e   :  { %v493_v49 = vadd.f32 %v492_v45, %v491_v41  ;;  %v503_v50 = vadd.f32 %v502_v46, %v488_v42  ;;  %v568_v45 = vsub.s32 6, %v1227_v33 }
 0x25f   :  { %v500_v51 = vrot.slane %v499_v47, 1  ;;  %v510_v53 = vrot.slane %v509_v48, 2 }
 0x260   :  { %v494_v57 = vrot.slane %v493_v49, 1  ;;  %v504_v58 = vrot.slane %v503_v50, 2 }
 0x261   :  { %v501_v59 = vadd.f32 %v500_v51, %v499_v47  ;;  %v511_v60 = vadd.f32 %v510_v53, %v509_v48  ;;  %v588_v47 = vsub.s32 7, %v1227_v33 }
 0x262   :  { %v495_v61 = vadd.f32 %v494_v57, %v493_v49  ;;  %v505_v63 = vadd.f32 %v504_v58, %v503_v50 }
 0x263   :  { %v515_v0 = vmul.f32 0.125, %v501_v59  ;;  %v512_v54 = vrot.slane %v511_v60, 1  ;;  %v589_v57 = vrot.slane %v1229_v34, %v588_v47 }
 0x264   :  { %v514_v1 = vmul.f32 0.125, %v495_v61  ;;  %v506_v55 = vrot.slane %v505_v63, 1 }
 0x265   :  { %v519_v2 = vsub.f32 %v487_v29, %v515_v0  ;;  %v513_v3 = vadd.f32 %v512_v54, %v511_v60 }
 0x266   :  { %v518_v62 = vsub.f32 %v486_v30, %v514_v1  ;;  %v507_v52 = vadd.f32 %v506_v55, %v505_v63 }
 0x267   :  { %v523_v5 = vmul.f32 %v519_v2, %v519_v2  ;;  %v517_v6 = vmul.f32 0.125, %v513_v3 }
 0x268   :  { %v522_v56 = vmul.f32 %v518_v62, %v518_v62  ;;  %v516_v4 = vmul.f32 0.125, %v507_v52 }
 0x269   :  { %v532_v7 = vrot.slane %v523_v5, 4  ;;  %v521_v8 = vsub.f32 %v489_v40, %v517_v6 }
 0x26a   :  { %v526_v9 = vrot.slane %v522_v56, 4  ;;  %v520_v10 = vsub.f32 %v488_v42, %v516_v4 }
 0x26b   :  { %v533_v11 = vadd.f32 %v532_v7, %v523_v5  ;;  %v525_v12 = vmul.f32 %v521_v8, %v521_v8 }
 0x26c   :  { %v527_v13 = vadd.f32 %v526_v9, %v522_v56  ;;  %v524_v14 = vmul.f32 %v520_v10, %v520_v10  ;;  %v722_v56 = vld [vmem:[#allocation5 + $0x8] ss:$0 sm:$0xff] }
 0x26d   :  { %v534_v15 = vrot.slane %v533_v11, 2  ;;  %v544_v16 = vrot.slane %v525_v12, 4 }
 0x26e   :  { %v528_v17 = vrot.slane %v527_v13, 2  ;;  %v538_v18 = vrot.slane %v524_v14, 4 }
 0x26f   :  { %v535_v19 = vadd.f32 %v534_v15, %v533_v11  ;;  %v545_v20 = vadd.f32 %v544_v16, %v525_v12 }
 0x270   :  { %v529_v21 = vadd.f32 %v528_v17, %v527_v13  ;;  %v539_v22 = vadd.f32 %v538_v18, %v524_v14 }
 0x271   :  { %v536_v23 = vrot.slane %v535_v19, 1  ;;  %v546_v24 = vrot.slane %v545_v20, 2 }
 0x272   :  { %v530_v25 = vrot.slane %v529_v21, 1  ;;  %v540_v26 = vrot.slane %v539_v22, 2 }
 0x273   :  { %v537_v27 = vadd.f32 %v536_v23, %v535_v19  ;;  %v547_v28 = vadd.f32 %v546_v24, %v545_v20 }
 0x274   :  { %v531_v29 = vadd.f32 %v530_v25, %v529_v21  ;;  %v541_v30 = vadd.f32 %v540_v26, %v539_v22 }
 0x275   :  { %v551_v31 = vmul.f32 0.125, %v537_v27  ;;  %v548_v32 = vrot.slane %v547_v28, 1 }
 0x276   :  { %v550_v35 = vmul.f32 0.125, %v531_v29  ;;  %v542_v36 = vrot.slane %v541_v30, 1 }
 0x277   :  { %v555_v37 = vadd.f32 1e-05, %v551_v31  ;;  %v549_v38 = vadd.f32 %v548_v32, %v547_v28 }
 0x278   :  { %v554_v39 = vadd.f32 1e-05, %v550_v35  ;;  %v543_v40 = vadd.f32 %v542_v36, %v541_v30 }
 0x279   :  { %1031 = vrsqrt.f32 %v555_v37  ;;  %v553_v41 = vmul.f32 0.125, %v549_v38 }
 0x27a   :  { %1033 = vrsqrt.f32 %v554_v39  ;;  %v552_v42 = vmul.f32 0.125, %v543_v40 }
 0x27b   :  { %v557_v43 = vadd.f32 1e-05, %v553_v41 }
 0x27c   :  { %v556_v44 = vadd.f32 1e-05, %v552_v42 }
 0x27d   :  { %1035 = vrsqrt.f32 %v557_v43 }
 0x27e   :  { %1037 = vrsqrt.f32 %v556_v44 }
 0x283   :  { %v1032_v46 = vpop.eup %1031 }
 0x284   :  { %v1034_v48 = vpop.eup %1033  ;;  %v563_v49 = vmul.f32 %v1032_v46, %v1229_v34 }
 0x285   :  { %v562_v50 = vmul.f32 %v1034_v48, %v1229_v34 }
 0x286   :  { %v573_v51 = vrot.slane %v563_v49, %v568_v45 }
 0x287   :  { %v1036_v53 = vpop.eup %1035  ;;  %v569_v58 = vrot.slane %v562_v50, %v568_v45 }
 0x288   :  { %v1038_v59 = vpop.eup %1037  ;;  %v583_v60 = vmul.f32 %v573_v51, %v519_v2  ;;  %v565_v61 = vmul.f32 %v1036_v53, %v1229_v34 }
 0x289   :  { %v582_v63 = vmul.f32 %v569_v58, %v518_v62  ;;  %v564_v0 = vmul.f32 %v1038_v59, %v1229_v34 }
 0x28a   :  { %v581_v54 = vrot.slane %v565_v61, %v568_v45  ;;  %v591_v55 = vadd.f32 %v589_v57, %v583_v60 }
 0x28b   :  { %v590_v1 = vadd.f32 %v589_v57, %v582_v63  ;;  %v577_v33 = vrot.slane %v564_v0, %v568_v45 }
 0x28c   :  { %v585_v3 = vmul.f32 %v581_v54, %v521_v8 }
 0x28d   :  { %891 = vmatprep.mubr.f32.mxu0 %v590_v1  ;;  %v584_v52 = vmul.f32 %v577_v33, %v520_v10 }
 0x28e   :  { %892 = vmatmul.mubr.f32.vlgmr.msra.gmra.mrb[4].mxu0 %v591_v55  ;;  %v593_v6 = vadd.f32 %v589_v57, %v585_v3 }
 0x28f   :  { %v592_v5 = vadd.f32 %v589_v57, %v584_v52 }
 0x291   :  { %894 = vmatprep.mubr.f32.mxu1 %v592_v5 }
 0x292   :  { %895 = vmatmul.mubr.f32.vlgmr.msra.gmra.mrb[4].mxu1 %v593_v6 }
 0x361   :  { %v893_v4 = vpop.f32.mrb[4].mxu0 }
 0x362   :  { %v687_v2 = vadd.f32 %v893_v4, %v722_v56  ;;  %v681_v7 = vpop.f32.mrb[5].mxu0 }
 0x363   :  { %v682_v9 = vadd.f32 %v722_v56, %v681_v7 }
 0x364   :  { %701 = vst [vmem:[#allocation8 + $0x8] sm:$0xff] %v687_v2 }
 0x365   :  { %700 = vst [vmem:[#allocation8] sm:$0xff] %v682_v9  ;;  %v896_v34 = vpop.f32.mrb[4].mxu1 }
 0x366   :  { %v697_v62 = vadd.f32 %v896_v34, %v722_v56  ;;  %v691_v11 = vpop.f32.mrb[5].mxu1 }
 0x367   :  { %v692_v8 = vadd.f32 %v722_v56, %v691_v11 }
 0x368   :  { %703 = vst [vmem:[#allocation8 + $0x18] sm:$0xff] %v697_v62 }
 0x369   :  { %702 = vst [vmem:[#allocation8 + $0x10] sm:$0xff] %v692_v8 }
 0x36a   :  { %1116 = shalt.err (!%p1113_p0)
}
 0x36b   :  { %s1117_s27 = scalar_lea.hbm %s1278_s3, 512 }
 0x36c   :  { %p1118_p1 = scmp.ne.s32.totalorder %s1278_s3, %s1117_s27  ;;  %p1121_p2 = scmp.lt.u32.totalorder %s1117_s27, %s1278_s3 }
 0x36e   :  { %p1123_p3 = pnand %p1121_p2, %p1118_p1 }
 0x370   :  { %1126 = shalt.err (!%p1123_p3)
}
 0x371   :  { %715 = dma.vmem_to_hbm [thread:$0]  %s710_s21, 512, %s1278_s3, [#allocation4], %s1135_s24, %s1135_s24, %s1136_s25  }
 0x372   :  { %1131 = dma.done.wait [#allocation4], 512  }
 0x373   :  { %1132 = vsyncadd [#allocation4], 4294966784 }
 0x374   :  { %719 = vsyncpa [#allocation3], 1 }
 0x375   :  { %720 = vsyncpa [#allocation6], 1 }
 0x376   :  { %721 = vsyncpa [#allocation4], 1 }

</bundles_post_ra>
